<compile_context>
chip_gen: v5e
topology: v5e:2x2
jax: 0.10.0
libtpu: 0.0.40
codegen_flags: <defaults>
</compile_context>

<pallas_src>
import jax
import jax.numpy as jnp
from jax.experimental import pallas as pl
from jax.experimental.pallas import tpu as pltpu

HIDDEN = 32
LN_EPS = 1e-5

# Above this batch size, tile B over a parallel grid (useful on v7x's 2 TCs
# and keeps VMEM bounded); below it, a single-shot kernel avoids per-grid-step
# pipeline overhead on the single-TC v5e/v6e.
_GRID_B_THRESHOLD = 1024
_GRID_TB = 512


def _cross_pooler_kernel(x0_ref, ln_g_ref, ln_b_ref, w_ref, bias_ref, out_ref):
    x0 = x0_ref[...]                                           # (B, H) f32, CLS only

    # ---- LayerNorm: one fused reduction pass (rsqrt -> EUP) ----
    inv_h = 1.0 / x0.shape[-1]
    s1 = jnp.sum(x0, axis=-1, keepdims=True)
    s2 = jnp.sum(x0 * x0, axis=-1, keepdims=True)
    mu = s1 * inv_h
    var = s2 * inv_h - mu * mu
    h = (x0 - mu) * jax.lax.rsqrt(var + LN_EPS) * ln_g_ref[0] + ln_b_ref[0]

    # ---- Dense: single batched MXU matmul ----
    y = jnp.dot(h, w_ref[...], preferred_element_type=jnp.float32) + bias_ref[0]

    # ---- QuickGELU (sigmoid -> EUP) ----
    out_ref[...] = y * jax.nn.sigmoid(1.702 * y)


def cross_pooler(hidden_states, hidden_mask, params):
    """hidden_states: (B, S, H) float32; hidden_mask is unused by the forward."""
    del hidden_mask  # CrossPooler.forward ignores it
    B, S, H = hidden_states.shape
    assert H == HIDDEN

    # DMA only the CLS token into the kernel (S-fold less HBM traffic).
    cls = hidden_states[:, 0, :]                               # (B, H)

    weights = (params["ln_g"], params["ln_b"], params["w_t"], params["b"])

    def const_spec(arr):
        # Weights: constant block index -> never re-DMA'd across grid steps.
        nd = arr.ndim
        return pl.BlockSpec(arr.shape, lambda *_, _nd=nd: (0,) * _nd)

    if B > _GRID_B_THRESHOLD and B % _GRID_TB == 0:
        # Large-batch path: parallel B-grid (shards across v7x's 2 TCs, keeps
        # the per-step VMEM block small regardless of B).
        grid = (B // _GRID_TB,)
        in_specs = [pl.BlockSpec((_GRID_TB, H), lambda i: (i, 0))] + [
            const_spec(w) for w in weights
        ]
        out_specs = pl.BlockSpec((_GRID_TB, H), lambda i: (i, 0))
        compiler_params = pltpu.CompilerParams(dimension_semantics=("parallel",))
    else:
        # Small/medium batch: single invocation, no grid-step overhead.
        grid = ()
        in_specs = [const_spec(cls)] + [const_spec(w) for w in weights]
        out_specs = pl.BlockSpec((B, H), lambda *_: (0, 0))
        compiler_params = None

    # NOTE: with H=32 the output store is lane-masked (32/128 lanes). If the
    # module is instantiated with H >= 128 in production, H stays the last
    # (lane) dim of every block here, so stores become unmasked automatically.
    return pl.pallas_call(
        _cross_pooler_kernel,
        out_shape=jax.ShapeDtypeStruct((B, H), jnp.float32),
        grid=grid,
        in_specs=in_specs,
        out_specs=out_specs,
        compiler_params=compiler_params,
    )(cls, *weights)


def make_params(key):
    kg, kb, kw, kbi = jax.random.split(key, 4)
    H = HIDDEN
    return {
        "ln_g": (1.0 + 0.1 * jax.random.normal(kg, (1, H))).astype(jnp.float32),
        "ln_b": (0.1 * jax.random.normal(kb, (1, H))).astype(jnp.float32),
        # dense weight stored pre-transposed so the kernel does h @ W^T directly
        "w_t": (0.05 * jax.random.normal(kw, (H, H))).astype(jnp.float32),
        "b":   (0.05 * jax.random.normal(kbi, (1, H))).astype(jnp.float32),
    }


def _reference(hidden_states, hidden_mask, p):
    """Pure-JAX reference reproducing the PyTorch forward semantics."""
    mu = jnp.mean(hidden_states, axis=-1, keepdims=True)
    var = jnp.mean((hidden_states - mu) ** 2, axis=-1, keepdims=True)
    h = (hidden_states - mu) / jnp.sqrt(var + LN_EPS) * p["ln_g"][0] + p["ln_b"][0]
    pooled = h[:, 0]
    y = pooled @ p["w_t"] + p["b"][0]
    return y * jax.nn.sigmoid(1.702 * y)


if __name__ == "__main__":
    key = jax.random.PRNGKey(0)
    k_x, k_m, k_p = jax.random.split(key, 3)

    B, S, H = 2, 8, HIDDEN
    hidden_states = jax.random.normal(k_x, (B, S, H), jnp.float32)
    hidden_mask = (jax.random.uniform(k_m, (B, S)) > 0.2).astype(jnp.float32)

    params = make_params(k_p)

    y = cross_pooler(hidden_states, hidden_mask, params)
    jax.block_until_ready(y)

    y_ref = _reference(hidden_states, hidden_mask, params)
    assert y.shape == (B, H)
    assert jnp.allclose(y, y_ref, atol=1e-4, rtol=1e-4), "mismatch vs JAX reference"

    print("KERNEL_OK")
</pallas_src>

<mosaic_0001>
module attributes {stable_mosaic.version = 11 : i64} {
  func.func @_cross_pooler_kernel(%arg0: memref<2x32xf32, #tpu.memory_space<vmem>>, %arg1: memref<1x32xf32, #tpu.memory_space<vmem>>, %arg2: memref<1x32xf32, #tpu.memory_space<vmem>>, %arg3: memref<32x32xf32, #tpu.memory_space<vmem>>, %arg4: memref<1x32xf32, #tpu.memory_space<vmem>>, %arg5: memref<2x32xf32, #tpu.memory_space<vmem>>) attributes {dimension_semantics = [], scalar_prefetch = 0 : i64, scratch_operands = 0 : i64, tpu.core_type = #tpu.core_type<tc>} {
    %c0 = arith.constant 0 : index
    %c0_0 = arith.constant 0 : index
    %0 = vector.load %arg0[%c0, %c0_0] : memref<2x32xf32, #tpu.memory_space<vmem>>, vector<2x32xf32>
    %cst = arith.constant dense<0.000000e+00> : vector<2xf32>
    %1 = vector.multi_reduction <add>, %0, %cst [1] : vector<2x32xf32> to vector<2xf32>
    %2 = vector.shape_cast %1 : vector<2xf32> to vector<2x1xf32>
    %3 = arith.mulf %0, %0 : vector<2x32xf32>
    %cst_1 = arith.constant dense<0.000000e+00> : vector<2xf32>
    %4 = vector.multi_reduction <add>, %3, %cst_1 [1] : vector<2x32xf32> to vector<2xf32>
    %5 = vector.shape_cast %4 : vector<2xf32> to vector<2x1xf32>
    %cst_2 = arith.constant 3.125000e-02 : f32
    %6 = vector.broadcast %cst_2 : f32 to vector<2x1xf32>
    %7 = arith.mulf %2, %6 : vector<2x1xf32>
    %cst_3 = arith.constant 3.125000e-02 : f32
    %8 = vector.broadcast %cst_3 : f32 to vector<2x1xf32>
    %9 = arith.mulf %5, %8 : vector<2x1xf32>
    %10 = arith.mulf %7, %7 : vector<2x1xf32>
    %11 = arith.subf %9, %10 : vector<2x1xf32>
    %12 = vector.broadcast %7 : vector<2x1xf32> to vector<2x32xf32>
    %13 = arith.subf %0, %12 : vector<2x32xf32>
    %cst_4 = arith.constant 9.99999974E-6 : f32
    %14 = vector.broadcast %cst_4 : f32 to vector<2x1xf32>
    %15 = arith.addf %11, %14 : vector<2x1xf32>
    %16 = math.rsqrt %15 : vector<2x1xf32>
    %17 = vector.broadcast %16 : vector<2x1xf32> to vector<2x32xf32>
    %18 = arith.mulf %13, %17 : vector<2x32xf32>
    %c0_5 = arith.constant 0 : index
    %c0_6 = arith.constant 0 : index
    %19 = vector.load %arg1[%c0_5, %c0_6] : memref<1x32xf32, #tpu.memory_space<vmem>>, vector<1x32xf32>
    %20 = vector.shape_cast %19 : vector<1x32xf32> to vector<32xf32>
    %21 = vector.shape_cast %20 : vector<32xf32> to vector<1x32xf32>
    %22 = vector.broadcast %21 : vector<1x32xf32> to vector<2x32xf32>
    %23 = arith.mulf %18, %22 : vector<2x32xf32>
    %c0_7 = arith.constant 0 : index
    %c0_8 = arith.constant 0 : index
    %24 = vector.load %arg2[%c0_7, %c0_8] : memref<1x32xf32, #tpu.memory_space<vmem>>, vector<1x32xf32>
    %25 = vector.shape_cast %24 : vector<1x32xf32> to vector<32xf32>
    %26 = vector.shape_cast %25 : vector<32xf32> to vector<1x32xf32>
    %27 = vector.broadcast %26 : vector<1x32xf32> to vector<2x32xf32>
    %28 = arith.addf %23, %27 : vector<2x32xf32>
    %c0_9 = arith.constant 0 : index
    %c0_10 = arith.constant 0 : index
    %29 = vector.load %arg3[%c0_9, %c0_10] : memref<32x32xf32, #tpu.memory_space<vmem>>, vector<32x32xf32>
    %cst_11 = arith.constant dense<0.000000e+00> : vector<2x32xf32>
    %30 = tpu.matmul %28, %29, %cst_11 {dimension_numbers = #tpu.dot_dimension_numbers<[1], [0], [0], [1], [0, 0, 1, 1], [], []>} : vector<2x32xf32>, vector<32x32xf32>, vector<2x32xf32> -> vector<2x32xf32>
    %c0_12 = arith.constant 0 : index
    %c0_13 = arith.constant 0 : index
    %31 = vector.load %arg4[%c0_12, %c0_13] : memref<1x32xf32, #tpu.memory_space<vmem>>, vector<1x32xf32>
    %32 = vector.shape_cast %31 : vector<1x32xf32> to vector<32xf32>
    %33 = vector.shape_cast %32 : vector<32xf32> to vector<1x32xf32>
    %34 = vector.broadcast %33 : vector<1x32xf32> to vector<2x32xf32>
    %35 = arith.addf %30, %34 : vector<2x32xf32>
    %cst_14 = arith.constant 1.702000e+00 : f32
    %36 = vector.broadcast %cst_14 : f32 to vector<2x32xf32>
    %37 = arith.mulf %36, %35 : vector<2x32xf32>
    %38 = arith.negf %37 : vector<2x32xf32>
    %39 = math.exp %38 : vector<2x32xf32>
    %cst_15 = arith.constant 1.000000e+00 : f32
    %40 = vector.broadcast %cst_15 : f32 to vector<2x32xf32>
    %41 = arith.addf %40, %39 : vector<2x32xf32>
    %42 = arith.divf %40, %41 : vector<2x32xf32>
    %43 = arith.mulf %35, %42 : vector<2x32xf32>
    %c0_16 = arith.constant 0 : index
    %c0_17 = arith.constant 0 : index
    %44 = vector.load %arg5[%c0_16, %c0_17] : memref<2x32xf32, #tpu.memory_space<vmem>>, vector<2x32xf32>
    tpu.vector_store %arg5[%c0_16, %c0_17], %43 {strides = array<i32>} : memref<2x32xf32, #tpu.memory_space<vmem>>, vector<2x32xf32>,
    return
  }
}

</mosaic_0001>

<bundles_post_ra>
// kernel: tpu_custom_call.1
= control target key start
LH: loop header
LB: loop body
LE: loop exit
PB: predicated region body
PF: predicated region fallthrough
CT: control target
= control target key end

     0   :  { %10 = vsyncpa [#allocation3], 0  ;;  %s348_s0 = inlined_call_operand.hbm [shape: f32[2,32], index: 0, kind: input, shape index: {}]   ;;  %s349_s1 = inlined_call_operand.hbm [shape: f32[1,32], index: 1, kind: input, shape index: {}]   ;;  %s350_s2 = inlined_call_operand.vmem [shape: f32[1,32], index: 2, kind: input, shape index: {}]   ;;  %s351_s3 = inlined_call_operand.hbm [shape: f32[32,32], index: 3, kind: input, shape index: {}]   ;;  %s352_s4 = inlined_call_operand.vmem [shape: f32[1,32], index: 4, kind: input, shape index: {}]   ;;  %s353_s5 = inlined_call_operand.hbm [shape: f32[2,32], index: 5, kind: output, shape index: {}]  }
   0x1   :  { %11 = vsyncpa [#allocation6], 0  ;;  %s29_s20 = sshll.u32 %s349_s1, 4  ;;  %s30_s20 = int_to_ptr.hbm [resolvable:$true] %s29_s20 }
   0x2   :  { %12 = vsyncpa [#allocation4], 0  ;;  %s291_s21 = smov [#allocation5]   ;;  %s18_s25 = sshll.u32 %s348_s0, 4  ;;  %s19_s25 = int_to_ptr.hbm [resolvable:$true] %s18_s25 }
   0x3   :  { %s31_s22 = sshll.u32 %s291_s21, 4  ;;  %s292_s26 = smov [#allocation2]   ;;  %s32_s22 = int_to_ptr.vmem [resolvable:$true] %s31_s22 }
   0x4   :  { %34 = dma.hbm_to_vmem [thread:$0]  %s30_s20, 16, %s32_s22, [#allocation6]  }
   0x5   :  { %s20_s27 = sshll.u32 %s292_s26, 4  ;;  %s41_s30 = sshll.u32 %s351_s3, 4  ;;  %s21_s27 = int_to_ptr.vmem [resolvable:$true] %s20_s27  ;;  %s42_s30 = int_to_ptr.hbm [resolvable:$true] %s41_s30 }
   0x6   :  { %23 = dma.hbm_to_vmem [thread:$0]  %s19_s25, 32, %s21_s27, [#allocation3]  }
   0x7   :  { %s293_s1 = smov [#allocation7]   ;;  %s294_s7 = smov 128  }
   0x8   :  { %s43_s6 = sshll.u32 %s293_s1, 4  ;;  %s295_s8 = smov 8   ;;  %s44_s6 = int_to_ptr.vmem [resolvable:$true] %s43_s6 }
   0x9   :  { %49 = dma.hbm_to_vmem [thread:$0]  %s42_s30, 512, %s44_s6, [#allocation6], %s294_s7, %s294_s7, %s295_s8  }
   0xa   :  { %285 = dma.done.wait [#allocation3], 32  }
   0xb   :  { %286 = vsyncadd [#allocation3], 4294967264 }
   0xc   :  { %287 = dma.done.wait [#allocation6], 528  }
   0xd   :  { %288 = vsyncadd [#allocation6], 4294966768  ;;  %vm65_vm0 = vcmask 254976   ;;  %v64_v0 = vld [vmem:[#allocation2] sm:$0x3]  ;;  %v102_v5 = vld [vmem:[#allocation7 + $0x10] sm:$0xff] }
   0xe   :  { %v66_v1 = vsel %vm65_vm0, %v64_v0, 0.0  ;;  %v69_v2 = vmul.f32 %v64_v0, %v64_v0  ;;  %v103_v4 = vld [vmem:[#allocation7 + $0x18] sm:$0xff]  ;;  %v101_v7 = vld [vmem:[#allocation7 + $0x8] sm:$0xff]  ;;  %v100_v8 = vld [vmem:[#allocation7] sm:$0xff]  ;;  %vm108_vm4 = vcmask 261120   ;;  %s161_s13 = sshll.u32 %s353_s5, 4  ;;  %s162_s13 = int_to_ptr.hbm [resolvable:$true] %s161_s13 }
   0xf   :  { %67 = vadd.xlane.f32.xlu0 %v66_v1  ;;  %124 = vmatpush.msra.mxu0 %v103_v4  ;;  %v180_v22 = vld [vmem:[#allocation5] ss:$0 sm:$0xff]  ;;  %v181_v25 = vld [vmem:[%s350_s2] ss:$0 sm:$0xff]  ;;  %s296_s2 = smov [#allocation8]  }
  0x10   :  { %v70_v3 = vsel %vm65_vm0, %v69_v2, 0.0  ;;  %v182_v28 = vld [vmem:[%s352_s4] ss:$0 sm:$0xff]  ;;  %s159_s4 = sshll.u32 %s296_s2, 4  ;;  %s160_s4 = int_to_ptr.vmem [resolvable:$true] %s159_s4 }
  0x11   :  { %125 = vmatpush.msra.mxu0 %v102_v5 }
  0x13   :  { %126 = vmatpush.msra.mxu0 %v101_v7 }
  0x15   :  { %127 = vmatpush.msra.mxu0 %v100_v8 }
  0x17   :  { %71 = vadd.xlane.f32.xlu0 %v70_v3 }
  0x82   :  { %v68_v6 = vpop.xlane.xlu0 %67 }
  0x83   :  { %v73_v9 = vmul.f32 0.03125, %v68_v6 }
  0x85   :  { %v75_v11 = vmul.f32 %v73_v9, %v73_v9  ;;  %v77_v21 = vsub.f32 %v64_v0, %v73_v9 }
  0x8a   :  { %v72_v10 = vpop.xlane.xlu0 %71 }
  0x8b   :  { %v74_v12 = vmul.f32 0.03125, %v72_v10 }
  0x8d   :  { %v76_v13 = vsub.f32 %v74_v12, %v75_v11 }
  0x8f   :  { %v78_v14 = vadd.f32 1e-05, %v76_v13 }
  0x91   :  { %183 = vrsqrt.f32 %v78_v14  ;;  %vm85_vm2 = vweird.f32 %v78_v14 }
  0x97   :  { %v184_v15 = vpop.eup %183 }
  0x98   :  { %v80_v16 = vmul.f32 %v184_v15, %v78_v14  ;;  %vm86_vm1 = vweird.f32 %v184_v15 }
  0x99   :  { %vm87_vm3 = vmor %vm85_vm2, %vm86_vm1 }
  0x9a   :  { %v81_v17 = vmul.f32 %v184_v15, %v80_v16 }
  0x9c   :  { %v82_v18 = vmul.f32 0.5, %v81_v17 }
  0x9e   :  { %v83_v19 = vsub.f32 1.5, %v82_v18 }
  0xa0   :  { %v84_v20 = vmul.f32 %v184_v15, %v83_v19 }
  0xa2   :  { %v88_v23 = vsel %vm87_vm3, %v184_v15, %v84_v20 }
  0xa3   :  { %v89_v24 = vmul.f32 %v88_v23, %v77_v21 }
  0xa5   :  { %v94_v26 = vmul.f32 %v180_v22, %v89_v24 }
  0xa7   :  { %v99_v27 = vadd.f32 %v181_v25, %v94_v26 }
  0xa9   :  { %172 = vmatmul.msk.f32.vlgmr.msra.gmra.mxu0 %vm108_vm4, %v99_v27 }
 0x126   :  { %v129_v29 = vpop.f32.mrf.mxu0 }
 0x127   :  { %v130_v30 = vadd.f32 %v182_v28, %v129_v29 }
 0x129   :  { %v173_v31 = vmul.f32 -1.702, %v130_v30 }
 0x12b   :  { %v134_v32 = vmul.f32 1.442695, %v173_v31 }
 0x12d   :  { %185 = vpow2.f32 %v134_v32 }
 0x133   :  { %v186_v33 = vpop.eup %185 }
 0x134   :  { %v136_v34 = vadd.f32 1.0, %v186_v33 }
 0x136   :  { %187 = vrcp.f32 %v136_v34  ;;  %v148_v38 = vand.u32 2147483648, %v136_v34  ;;  %v146_v40 = vand.u32 2147483647, %v136_v34  ;;  %vm142_vm6 = vweird.f32 %v136_v34 }
 0x138   :  { %v149_v42 = vor.u32 1.1754944e-38, %v148_v38  ;;  %vm147_vm8 = vcmp.eq.f32.partialorder %v146_v40, 8.507059e+37 }
 0x13c   :  { %v188_v35 = vpop.eup %187 }
 0x13d   :  { %v138_v36 = vmul.f32 %v188_v35, %v136_v34  ;;  %vm143_vm5 = vweird.f32 %v188_v35 }
 0x13e   :  { %vm144_vm7 = vmor %vm142_vm6, %vm143_vm5 }
 0x13f   :  { %v139_v37 = vsub.f32 1.0, %v138_v36 }
 0x141   :  { %v140_v39 = vmul.f32 %v188_v35, %v139_v37 }
 0x143   :  { %v141_v41 = vadd.f32 %v188_v35, %v140_v39 }
 0x145   :  { %v145_v43 = vsel %vm144_vm7, %v188_v35, %v141_v41 }
 0x146   :  { %v150_v44 = vsel %vm147_vm8, %v149_v42, %v145_v43 }
 0x147   :  { %v152_v45 = vmul.f32 %v150_v44, %v130_v30 }
 0x149   :  { %153 = vst.msk [vmem:[#allocation8] sm:$0x3] %vm65_vm0, %v152_v45 }
 0x14a   :  { %164 = dma.vmem_to_hbm [thread:$0]  %s160_s4, 32, %s162_s13, [#allocation4]  }
 0x14b   :  { %289 = dma.done.wait [#allocation4], 32  }
 0x14c   :  { %290 = vsyncadd [#allocation4], 4294967264 }
 0x14d   :  { %169 = vsyncpa [#allocation3], 1 }
 0x14e   :  { %170 = vsyncpa [#allocation6], 1 }
 0x14f   :  { %171 = vsyncpa [#allocation4], 1 }

</bundles_post_ra>
